<compile_context>
chip_gen: v6e
topology: v6e:2x2x1
jax: 0.10.0
libtpu: 0.0.40
codegen_flags: <defaults>
</compile_context>

<pallas_src>
import functools
import numpy as np

import jax
import jax.numpy as jnp
from jax.experimental import pallas as pl
from jax.experimental.pallas import tpu as pltpu


# -----------------------------------------------------------------------------
# Fused encoder layer kernel (MHSA + FFN + both LayerNorms in one pallas_call)
# -----------------------------------------------------------------------------

def _encoder_layer_kernel(x_ref, wqkv_ref, wo_ref, ln1g_ref, ln1b_ref,
                          w1_ref, b1_ref, w2_ref, b2_ref, ln2g_ref, ln2b_ref,
                          o_ref, *, heads, dk, scale, eps):
    x = x_ref[0].astype(jnp.float32)                          # (S, C)
    HD = heads * dk

    # --- fused QKV projection: one MXU pass, bf16 operands, f32 accumulate ---
    qkv = jnp.dot(x.astype(jnp.bfloat16), wqkv_ref[...],
                  preferred_element_type=jnp.float32)         # (S, 3*HD)
    q = (qkv[:, :HD] * scale).astype(jnp.bfloat16)            # scale folded in q
    k = qkv[:, HD:2 * HD].astype(jnp.bfloat16)
    v = qkv[:, 2 * HD:].astype(jnp.bfloat16)

    # --- per-head scaled-dot-product attention, all resident in VMEM ---
    outs = []
    for h in range(heads):                                    # static unroll
        qh = q[:, h * dk:(h + 1) * dk]
        kh = k[:, h * dk:(h + 1) * dk]
        vh = v[:, h * dk:(h + 1) * dk]
        # contract over dk of both operands (no materialized k.T)
        s = jax.lax.dot_general(qh, kh, (((1,), (1,)), ((), ())),
                                preferred_element_type=jnp.float32)  # (S, S)
        s = s - jnp.max(s, axis=-1, keepdims=True)
        p = jnp.exp(s)
        p = p * pl.reciprocal(jnp.sum(p, axis=-1, keepdims=True), approx=True)
        outs.append(jnp.dot(p.astype(jnp.bfloat16), vh,
                            preferred_element_type=jnp.float32))     # (S, dk)
    attn = jnp.concatenate(outs, axis=-1)                     # (S, H*dk)

    attn = jnp.dot(attn.astype(jnp.bfloat16), wo_ref[...],
                   preferred_element_type=jnp.float32)        # (S, C)

    # --- residual add + LayerNorm 1 (f32 on VPU) ---
    h1 = attn + x
    mu = jnp.mean(h1, axis=-1, keepdims=True)
    var = jnp.mean(jnp.square(h1 - mu), axis=-1, keepdims=True)
    h1 = (h1 - mu) * jax.lax.rsqrt(var + eps)
    h1 = h1 * ln1g_ref[...] + ln1b_ref[...]

    # --- position-wise FFN; the (S, 4C) intermediate never leaves VMEM ---
    f = jnp.dot(h1.astype(jnp.bfloat16), w1_ref[...],
                preferred_element_type=jnp.float32) + b1_ref[...]
    f = jnp.maximum(f, 0.0)
    f = jnp.dot(f.astype(jnp.bfloat16), w2_ref[...],
                preferred_element_type=jnp.float32) + b2_ref[...]

    # --- residual add + LayerNorm 2 ---
    y = f + h1
    mu = jnp.mean(y, axis=-1, keepdims=True)
    var = jnp.mean(jnp.square(y - mu), axis=-1, keepdims=True)
    y = (y - mu) * jax.lax.rsqrt(var + eps)
    y = y * ln2g_ref[...] + ln2b_ref[...]

    o_ref[0] = y.astype(o_ref.dtype)


def encoder_layer(x, lp, *, heads, dk, scale, eps=1e-6):
    """x: (B, S, C) f32 -> (B, S, C). One fused pallas_call; grid over batch."""
    B, S, C = x.shape
    HD = heads * dk
    Dff = lp["w1"].shape[1]

    def w_spec(shape):
        return pl.BlockSpec(shape, lambda b: (0, 0))

    return pl.pallas_call(
        functools.partial(_encoder_layer_kernel, heads=heads, dk=dk,
                          scale=scale, eps=eps),
        out_shape=jax.ShapeDtypeStruct((B, S, C), x.dtype),
        grid=(B,),
        in_specs=[
            pl.BlockSpec((1, S, C), lambda b: (b, 0, 0)),     # activations
            w_spec((C, 3 * HD)),                              # wqkv (fused)
            w_spec((HD, C)),                                  # wo
            w_spec((1, C)), w_spec((1, C)),                   # ln1 gamma/beta
            w_spec((C, Dff)), w_spec((1, Dff)),               # w1, b1
            w_spec((Dff, C)), w_spec((1, C)),                 # w2, b2
            w_spec((1, C)), w_spec((1, C)),                   # ln2 gamma/beta
        ],
        out_specs=pl.BlockSpec((1, S, C), lambda b: (b, 0, 0)),
        compiler_params=pltpu.CompilerParams(
            dimension_semantics=("parallel",)),
    )(x, lp["wqkv"], lp["wo"], lp["ln1_g"], lp["ln1_b"],
      lp["w1"], lp["b1"], lp["w2"], lp["b2"], lp["ln2_g"], lp["ln2_b"])


# -----------------------------------------------------------------------------
# Standalone LayerNorm (encoder input LN — no residual, no zero-tensor DMA)
# -----------------------------------------------------------------------------

def _layernorm_kernel(x_ref, g_ref, b_ref, o_ref, *, eps):
    x = x_ref[...].astype(jnp.float32)
    mu = jnp.mean(x, axis=-1, keepdims=True)
    var = jnp.mean(jnp.square(x - mu), axis=-1, keepdims=True)
    xn = (x - mu) * jax.lax.rsqrt(var + eps)
    o_ref[...] = (xn * g_ref[...] + b_ref[...]).astype(o_ref.dtype)


def layernorm(x, gamma, beta, eps=1e-6):
    M, D = x.shape
    return pl.pallas_call(
        functools.partial(_layernorm_kernel, eps=eps),
        out_shape=jax.ShapeDtypeStruct((M, D), x.dtype),
        grid=(1,),
        in_specs=[pl.BlockSpec((M, D), lambda i: (0, 0)),
                  pl.BlockSpec((1, D), lambda i: (0, 0)),
                  pl.BlockSpec((1, D), lambda i: (0, 0))],
        out_specs=pl.BlockSpec((M, D), lambda i: (0, 0)),
    )(x, gamma, beta)


# -----------------------------------------------------------------------------
# Tiled output projection: (M, C) @ (C, vocab) + bias
# -----------------------------------------------------------------------------

def _logits_kernel(x_ref, w_ref, b_ref, o_ref):
    acc = jnp.dot(x_ref[...].astype(jnp.bfloat16), w_ref[...],
                  preferred_element_type=jnp.float32)
    o_ref[...] = (acc + b_ref[...]).astype(o_ref.dtype)


def _pick_tile(dim, pref):
    if dim <= pref:
        return dim
    t = pref
    while t >= 128:
        if dim % t == 0:
            return t
        t //= 2
    return dim  # fallback: whole axis in one block


def logits_linear(x, w, b, *, tm_pref=256, tn_pref=1024):
    """x: (M, K) f32, w: (K, N) bf16, b: (1, N) f32 -> (M, N) f32.
    Grid tiles M and N ("parallel" for megacore); K = num_channels fits VMEM."""
    M, K = x.shape
    N = w.shape[1]
    tm = _pick_tile(M, tm_pref)
    tn = _pick_tile(N, tn_pref)
    return pl.pallas_call(
        _logits_kernel,
        out_shape=jax.ShapeDtypeStruct((M, N), x.dtype),
        grid=(M // tm, N // tn),
        in_specs=[pl.BlockSpec((tm, K), lambda i, j: (i, 0)),
                  pl.BlockSpec((K, tn), lambda i, j: (0, j)),
                  pl.BlockSpec((1, tn), lambda i, j: (0, j))],
        out_specs=pl.BlockSpec((tm, tn), lambda i, j: (i, j)),
        compiler_params=pltpu.CompilerParams(
            dimension_semantics=("parallel", "parallel")),
    )(x, w, b)


# -----------------------------------------------------------------------------
# Parameters (deterministic, in-script)
# -----------------------------------------------------------------------------

def _sinusoid_table(n_position, d_hid):
    position = np.arange(n_position, dtype=np.float64)[:, None]
    hid = np.arange(d_hid)[None, :]
    angle = position / np.power(10000.0, 2 * (hid // 2) / d_hid)
    table = np.zeros((n_position, d_hid), dtype=np.float32)
    table[:, 0::2] = np.sin(angle[:, 0::2])
    table[:, 1::2] = np.cos(angle[:, 1::2])
    return jnp.asarray(table)


def init_params(key, *, vocab_size, heads, layers, num_channels, num_pos):
    C = num_channels
    dk = dv = C                       # dim_key = dim_value = num_channels
    d_inner = 4 * C

    def normal(k, shape, scale=0.02):
        return (scale * jax.random.normal(k, shape)).astype(jnp.float32)

    keys = jax.random.split(key, 4 + layers)
    params = {
        "item_emb": normal(keys[0], (vocab_size, C)),   # kept for fidelity; gather elided
        "src_word_emb": normal(keys[1], (C, C)),        # source_vocab_size == num_channels
        "pos_table": _sinusoid_table(num_pos, C),
        "enc_ln_g": jnp.ones((1, C), jnp.float32),
        "enc_ln_b": jnp.zeros((1, C), jnp.float32),
        "lin_op_w": normal(keys[2], (C, vocab_size)).astype(jnp.bfloat16),
        "lin_op_b": normal(keys[3], (1, vocab_size)),
        "layers": [],
    }
    for l in range(layers):
        lk = jax.random.split(keys[4 + l], 6)
        wq = normal(lk[0], (C, heads * dk))             # bias=False in reference MHA
        wk = normal(lk[1], (C, heads * dk))
        wv = normal(lk[2], (C, heads * dv))
        params["layers"].append({
            "wqkv": jnp.concatenate([wq, wk, wv], axis=1).astype(jnp.bfloat16),
            "wo": normal(lk[3], (heads * dv, C)).astype(jnp.bfloat16),
            "ln1_g": jnp.ones((1, C), jnp.float32),
            "ln1_b": jnp.zeros((1, C), jnp.float32),
            "w1": normal(lk[4], (C, d_inner)).astype(jnp.bfloat16),
            "b1": jnp.zeros((1, d_inner), jnp.float32),
            "w2": normal(lk[5], (d_inner, C)).astype(jnp.bfloat16),
            "b2": jnp.zeros((1, C), jnp.float32),
            "ln2_g": jnp.ones((1, C), jnp.float32),
            "ln2_b": jnp.zeros((1, C), jnp.float32),
        })
    return params


# -----------------------------------------------------------------------------
# Forward pass
# -----------------------------------------------------------------------------

def recommendation_forward(params, batch, *, heads, num_channels):
    B, S = batch.shape
    C = num_channels
    dk = C
    scale = 1.0 / float(np.sqrt(dk))
    # position ids 0..S-1 index the (C, C) src_word_emb table (source_vocab==C)
    assert S <= C, "sequence length exceeds Encoder source vocab (num_channels)"

    # The PyTorch item_embeddings(batch) result is only used for its shape;
    # the (B, S, C) gather is elided (pure wasted HBM bandwidth).

    # Encoder consumes arange positions (batch is overwritten in the reference);
    # the embedded sequence is identical for every batch row.
    pos_ids = jnp.arange(S, dtype=jnp.int32)
    emb = jnp.take(params["src_word_emb"], pos_ids, axis=0) \
        + params["pos_table"][:S, :]                             # (S, C)
    x = jnp.broadcast_to(emb[None], (B, S, C)).reshape(B * S, C).astype(jnp.float32)
    x = layernorm(x, params["enc_ln_g"], params["enc_ln_b"])     # initial LN
    x = x.reshape(B, S, C)

    for lp in params["layers"]:
        x = encoder_layer(x, lp, heads=heads, dk=dk, scale=scale)

    # op.permute(1, 0, 2): (B, S, C) -> (S, B, C), then Linear(C, vocab)
    op = jnp.transpose(x, (1, 0, 2)).reshape(S * B, C)
    logits = logits_linear(op, params["lin_op_w"], params["lin_op_b"])
    return logits.reshape(S, B, -1)                              # (S, B, vocab)


# -----------------------------------------------------------------------------
if __name__ == "__main__":
    # Small shapes consistent with the module's constructor arguments.
    vocab_size = 64
    heads = 4
    layers = 2
    num_channels = 32
    num_pos = 16
    B, S = 2, 8

    key = jax.random.PRNGKey(0)
    pkey, dkey = jax.random.split(key)
    params = init_params(pkey, vocab_size=vocab_size, heads=heads, layers=layers,
                         num_channels=num_channels, num_pos=num_pos)
    batch = jax.random.randint(dkey, (B, S), 1, vocab_size, dtype=jnp.int32)

    out = recommendation_forward(params, batch, heads=heads,
                                 num_channels=num_channels)
    out = jax.block_until_ready(out)
    assert out.shape == (S, B, vocab_size), out.shape
    assert jnp.all(jnp.isfinite(out))
    print("KERNEL_OK")
</pallas_src>

<mosaic_0001>
module attributes {stable_mosaic.version = 11 : i64} {
  func.func @_layernorm_kernel(%arg0: i32, %arg1: memref<16x32xf32, #tpu.memory_space<vmem>>, %arg2: memref<1x32xf32, #tpu.memory_space<vmem>>, %arg3: memref<1x32xf32, #tpu.memory_space<vmem>>, %arg4: memref<16x32xf32, #tpu.memory_space<vmem>>) attributes {dimension_semantics = [#tpu.dimension_semantics<arbitrary>], iteration_bounds = array<i64: 1>, scalar_prefetch = 0 : i64, scratch_operands = 0 : i64, tpu.core_type = #tpu.core_type<tc>, window_params = [{pipeline_mode = #tpu.pipeline_mode<synchronous>, transform_indices = @transform_0, window_bounds = array<i64: 16, 32>}, {pipeline_mode = #tpu.pipeline_mode<synchronous>, transform_indices = @transform_1, window_bounds = array<i64: 1, 32>}, {pipeline_mode = #tpu.pipeline_mode<synchronous>, transform_indices = @transform_2, window_bounds = array<i64: 1, 32>}, {pipeline_mode = #tpu.pipeline_mode<synchronous>, transform_indices = @transform_3, window_bounds = array<i64: 16, 32>}]} {
    %c0 = arith.constant 0 : index
    %c0_0 = arith.constant 0 : index
    %0 = vector.load %arg1[%c0, %c0_0] : memref<16x32xf32, #tpu.memory_space<vmem>>, vector<16x32xf32>
    %cst = arith.constant dense<0.000000e+00> : vector<16xf32>
    %1 = vector.multi_reduction <add>, %0, %cst [1] : vector<16x32xf32> to vector<16xf32>
    %2 = vector.shape_cast %1 : vector<16xf32> to vector<16x1xf32>
    %cst_1 = arith.constant 3.200000e+01 : f32
    %3 = vector.broadcast %cst_1 : f32 to vector<16x1xf32>
    %4 = arith.divf %2, %3 : vector<16x1xf32>
    %5 = vector.broadcast %4 : vector<16x1xf32> to vector<16x32xf32>
    %6 = arith.subf %0, %5 : vector<16x32xf32>
    %7 = arith.mulf %6, %6 : vector<16x32xf32>
    %cst_2 = arith.constant dense<0.000000e+00> : vector<16xf32>
    %8 = vector.multi_reduction <add>, %7, %cst_2 [1] : vector<16x32xf32> to vector<16xf32>
    %9 = vector.shape_cast %8 : vector<16xf32> to vector<16x1xf32>
    %cst_3 = arith.constant 3.200000e+01 : f32
    %10 = vector.broadcast %cst_3 : f32 to vector<16x1xf32>
    %11 = arith.divf %9, %10 : vector<16x1xf32>
    %12 = vector.broadcast %4 : vector<16x1xf32> to vector<16x32xf32>
    %13 = arith.subf %0, %12 : vector<16x32xf32>
    %cst_4 = arith.constant 9.99999997E-7 : f32
    %14 = vector.broadcast %cst_4 : f32 to vector<16x1xf32>
    %15 = arith.addf %11, %14 : vector<16x1xf32>
    %16 = math.rsqrt %15 : vector<16x1xf32>
    %17 = vector.broadcast %16 : vector<16x1xf32> to vector<16x32xf32>
    %18 = arith.mulf %13, %17 : vector<16x32xf32>
    %c0_5 = arith.constant 0 : index
    %c0_6 = arith.constant 0 : index
    %19 = vector.load %arg2[%c0_5, %c0_6] : memref<1x32xf32, #tpu.memory_space<vmem>>, vector<1x32xf32>
    %20 = vector.broadcast %19 : vector<1x32xf32> to vector<16x32xf32>
    %21 = arith.mulf %18, %20 : vector<16x32xf32>
    %c0_7 = arith.constant 0 : index
    %c0_8 = arith.constant 0 : index
    %22 = vector.load %arg3[%c0_7, %c0_8] : memref<1x32xf32, #tpu.memory_space<vmem>>, vector<1x32xf32>
    %23 = vector.broadcast %22 : vector<1x32xf32> to vector<16x32xf32>
    %24 = arith.addf %21, %23 : vector<16x32xf32>
    %c0_9 = arith.constant 0 : index
    %c0_10 = arith.constant 0 : index
    %25 = vector.load %arg4[%c0_9, %c0_10] : memref<16x32xf32, #tpu.memory_space<vmem>>, vector<16x32xf32>
    tpu.vector_store %arg4[%c0_9, %c0_10], %24 {strides = array<i32>} : memref<16x32xf32, #tpu.memory_space<vmem>>, vector<16x32xf32>,
    return
  }
  func.func @transform_0(%arg0: i32) -> (i32, i32) {
    %c0_i32 = arith.constant 0 : i32
    %c0_i32_0 = arith.constant 0 : i32
    %c0_i32_1 = arith.constant 0 : i32
    return %c0_i32, %c0_i32_0 : i32, i32
  }
  func.func @transform_1(%arg0: i32) -> (i32, i32) {
    %c0_i32 = arith.constant 0 : i32
    %c0_i32_0 = arith.constant 0 : i32
    %c0_i32_1 = arith.constant 0 : i32
    return %c0_i32, %c0_i32_0 : i32, i32
  }
  func.func @transform_2(%arg0: i32) -> (i32, i32) {
    %c0_i32 = arith.constant 0 : i32
    %c0_i32_0 = arith.constant 0 : i32
    %c0_i32_1 = arith.constant 0 : i32
    return %c0_i32, %c0_i32_0 : i32, i32
  }
  func.func @transform_3(%arg0: i32) -> (i32, i32) {
    %c0_i32 = arith.constant 0 : i32
    %c0_i32_0 = arith.constant 0 : i32
    %c0_i32_1 = arith.constant 0 : i32
    return %c0_i32, %c0_i32_0 : i32, i32
  }
}

</mosaic_0001>

<bundles_post_ra>
// kernel: tpu_custom_call.1
= control target key start
LH: loop header
LB: loop body
LE: loop exit
PB: predicated region body
PF: predicated region fallthrough
CT: control target
= control target key end

     0   :  { %8 = vsyncpa [#allocation3], 0  ;;  %s198_s0 = inlined_call_operand.hbm [shape: f32[16,32], index: 0, kind: input, shape index: {}]   ;;  %s199_s1 = inlined_call_operand.vmem [shape: f32[1,32], index: 1, kind: input, shape index: {}]   ;;  %s200_s2 = inlined_call_operand.vmem [shape: f32[1,32], index: 2, kind: input, shape index: {}]   ;;  %s201_s3 = inlined_call_operand.hbm [shape: f32[16,32], index: 3, kind: output, shape index: {}]  }
   0x1   :  { %9 = vsyncpa [#allocation4], 0  ;;  %s150_s12 = smov [#allocation2]  }
   0x2   :  { %s15_s13 = sshll.u32 %s150_s12, 4  ;;  %s16_s13 = int_to_ptr.vmem [resolvable:$true] %s15_s13 }
   0x3   :  { %s114_s14 = scalar_lea.vmem %s16_s13, 256  ;;  %p119_p1 = scmp.lt.s32.totalorder %s16_s13, %s16_s13 }
   0x4   :  { %p115_p0 = scmp.ne.s32.totalorder %s16_s13, %s114_s14  ;;  %p120_p2 = scmp.lt.s32.totalorder %s114_s14, %s114_s14 }
   0x6   :  { %p121_p3 = por %p120_p2, %p119_p1 }
   0x8   :  { %p122_p4 = pnand %p121_p3, %p115_p0 }
   0xa   :  { %125 = shalt.err (!%p122_p4)
}
   0xb   :  { %s151_s15 = smov 128   ;;  %s152_s16 = smov 8  }
   0xc   :  { %21 = dma.hbm_to_vmem [thread:$0]  %s198_s0, 256, %s16_s13, [#allocation3], %s151_s15, %s151_s15, %s152_s16  }
   0xd   :  { %146 = dma.done.wait [#allocation3], 256  }
   0xe   :  { %147 = vsyncadd [#allocation3], 4294967040  ;;  %vm31_vm0 = vcmask 261120   ;;  %v29_v0 = vld [vmem:[#allocation2] sm:$0xff]  ;;  %v30_v1 = vld [vmem:[#allocation2 + $0x8] sm:$0xff]  ;;  %s153_s22 = smov [#allocation5]  }
   0xf   :  { %v32_v2 = vsel %vm31_vm0, %v29_v0, 0.0  ;;  %v35_v3 = vsel %vm31_vm0, %v30_v1, 0.0  ;;  %v96_v21 = vld [vmem:[%s199_s1] ss:$0 sm:$0xff]  ;;  %s84_s23 = sshll.u32 %s153_s22, 4  ;;  %s85_s23 = int_to_ptr.vmem [resolvable:$true] %s84_s23 }
  0x10   :  { %33 = vadd.xlane.f32.xlu0 %v32_v2  ;;  %v97_v23 = vld [vmem:[%s200_s2] ss:$0 sm:$0xff]  ;;  %s126_s24 = scalar_lea.vmem %s85_s23, 256  ;;  %p131_p6 = scmp.lt.s32.totalorder %s85_s23, %s85_s23 }
  0x11   :  { %p127_p5 = scmp.ne.s32.totalorder %s85_s23, %s126_s24  ;;  %p132_p7 = scmp.lt.s32.totalorder %s126_s24, %s126_s24 }
  0x13   :  { %p133_p8 = por %p132_p7, %p131_p6 }
  0x14   :  { %36 = vadd.xlane.f32.xlu0 %v35_v3 }
  0x15   :  { %p134_p9 = pnand %p133_p8, %p127_p5 }
  0x99   :  { %v34_v4 = vpop.xlane.xlu0 %33 }
  0x9a   :  { %v39_v5 = vmul.f32 0.03125, %v34_v4 }
  0x9c   :  { %v41_v6 = vsub.f32 %v29_v0, %v39_v5 }
  0x9d   :  { %v37_v7 = vpop.xlane.xlu0 %36 }
  0x9e   :  { %v40_v8 = vmul.f32 0.03125, %v37_v7  ;;  %v43_v9 = vmul.f32 %v41_v6, %v41_v6 }
  0xa0   :  { %v42_v10 = vsub.f32 %v30_v1, %v40_v8  ;;  %v45_v11 = vsel %vm31_vm0, %v43_v9, 0.0 }
  0xa1   :  { %46 = vadd.xlane.f32.xlu1 %v45_v11 }
  0xa2   :  { %v44_v12 = vmul.f32 %v42_v10, %v42_v10 }
  0xa4   :  { %v48_v13 = vsel %vm31_vm0, %v44_v12, 0.0 }
  0xa5   :  { %49 = vadd.xlane.f32.xlu1 %v48_v13 }
 0x12a   :  { %v47_v14 = vpop.xlane.xlu1 %46 }
 0x12b   :  { %v51_v15 = vmul.f32 0.03125, %v47_v14 }
 0x12d   :  { %v53_v16 = vadd.f32 1e-06, %v51_v15 }
 0x12e   :  { %v50_v17 = vpop.xlane.xlu1 %49 }
 0x12f   :  { %102 = vrsqrt.f32 %v53_v16  ;;  %v52_v18 = vmul.f32 0.03125, %v50_v17 }
 0x131   :  { %v54_v19 = vadd.f32 1e-06, %v52_v18 }
 0x133   :  { %104 = vrsqrt.f32 %v54_v19 }
 0x13c   :  { %v103_v20 = vpop.eup %102 }
 0x13d   :  { %v57_v22 = vmul.f32 %v103_v20, %v41_v6 }
 0x13f   :  { %v66_v24 = vmul.f32 %v96_v21, %v57_v22 }
 0x140   :  { %v105_v25 = vpop.eup %104 }
 0x141   :  { %v58_v26 = vmul.f32 %v105_v25, %v42_v10  ;;  %v75_v27 = vadd.f32 %v97_v23, %v66_v24 }
 0x143   :  { %v67_v28 = vmul.f32 %v96_v21, %v58_v26  ;;  %77 = vst.msk [vmem:[#allocation5] sm:$0xff] %vm31_vm0, %v75_v27 }
 0x145   :  { %v76_v29 = vadd.f32 %v97_v23, %v67_v28 }
 0x147   :  { %78 = vst.msk [vmem:[#allocation5 + $0x8] sm:$0xff] %vm31_vm0, %v76_v29 }
 0x148   :  { %137 = shalt.err (!%p134_p9)
}
 0x149   :  { %90 = dma.vmem_to_hbm [thread:$0]  %s85_s23, 256, %s201_s3, [#allocation4], %s151_s15, %s151_s15, %s152_s16  }
 0x14a   :  { %148 = dma.done.wait [#allocation4], 256  }
 0x14b   :  { %149 = vsyncadd [#allocation4], 4294967040 }
 0x14c   :  { %94 = vsyncpa [#allocation3], 1 }
 0x14d   :  { %95 = vsyncpa [#allocation4], 1 }

</bundles_post_ra>
